<compile_context>
chip_gen: v5e
topology: v5e:2x2
jax: 0.10.0
libtpu: 0.0.40
codegen_flags: <defaults>
</compile_context>

<pallas_src>
import jax
import jax.numpy as jnp
from jax.experimental import pallas as pl
from jax.experimental.pallas import tpu as pltpu

# ----- model / problem sizes (small, consistent with the module) -------------
D_IMG = 64                      # img_features width
D_ENC = 32                      # encoding width (ingredients / instructions)
INP_DIMS = D_IMG + 2 * D_ENC    # 128
HIDDEN = 512                    # fixed by the module (fused away offline)
N_CLASSES = 16
N_ING = 8
N_INST = 6


def _classifier_kernel(img_ref, ing_ref, inst_ref, w_ref, b_ref, out_ref):
    # Means over the variable-length encoding lists (cross-sublane reduce, XLU).
    # TODO(synk): empty ing/inst lists would produce NaN here, matching the
    # original torch.mean behaviour; no guard is added.
    ing_mean = jnp.mean(ing_ref[...], axis=0, keepdims=True)    # (1, D_ENC)
    inst_mean = jnp.mean(inst_ref[...], axis=0, keepdims=True)  # (1, D_ENC)

    # TODO(synk): nn.Dropout(p=0.2) is identity in eval mode; training-mode
    # dropout is not implemented.

    # Fused affine head:  y = concat(img, ing_mean, inst_mean) @ (w1 @ w2) + (b1 @ w2 + b2)
    # The concat is avoided by contracting each piece against its (sublane-
    # aligned: rows 0/64/96) slice of the fused (128, 16) weight inside the
    # kernel.  f32 accumulation throughout (v5e-safe).
    y = (jnp.dot(img_ref[...], w_ref[0:D_IMG, :],
                 preferred_element_type=jnp.float32)
         + jnp.dot(ing_mean, w_ref[D_IMG:D_IMG + D_ENC, :],
                   preferred_element_type=jnp.float32)
         + jnp.dot(inst_mean, w_ref[D_IMG + D_ENC:INP_DIMS, :],
                   preferred_element_type=jnp.float32)
         + b_ref[...])                                           # (1, N_CLASSES)

    out_ref[...] = jax.nn.sigmoid(y)


def prepare_params(w1, b1, w2, b2):
    """One-time offline fusion of the two activation-free Linear layers.

    Linear2(Linear1(x)) == x @ (w1 @ w2) + (b1 @ w2 + b2)  -- exact (affine).
    Done in f32 at HIGHEST precision; fused weight is only 128x16 (8 KB).
    """
    w1 = w1.astype(jnp.float32)
    w2 = w2.astype(jnp.float32)
    w_fused = jnp.dot(w1, w2, precision=jax.lax.Precision.HIGHEST)          # (128, 16)
    b_fused = (jnp.dot(b1.astype(jnp.float32), w2,
                       precision=jax.lax.Precision.HIGHEST)
               + b2.astype(jnp.float32)).reshape(1, N_CLASSES)              # (1, 16)
    return w_fused, b_fused


def multilabel_classifier(img_features, ing_encodings, inst_encodings, params):
    """params = prepare_params(w1, b1, w2, b2); returns (1, N_CLASSES) f32."""
    w_fused, b_fused = params

    # torch's `.float()` cast after the concat.
    img_f = img_features.astype(jnp.float32)       # (1, D_IMG)
    ing_f = ing_encodings.astype(jnp.float32)      # (N_ING, D_ENC)
    inst_f = inst_encodings.astype(jnp.float32)    # (N_INST, D_ENC)

    vmem = pl.BlockSpec(memory_space=pltpu.MemorySpace.VMEM)

    bytes_accessed = (
        w_fused.size * 4 + b_fused.size * 4
        + (img_f.size + ing_f.size + inst_f.size) * 4
        + N_CLASSES * 4)
    cost = pl.CostEstimate(
        flops=2 * INP_DIMS * N_CLASSES + (N_ING + N_INST) * D_ENC,
        transcendentals=N_CLASSES,                 # sigmoid -> exp
        bytes_accessed=bytes_accessed)

    return pl.pallas_call(
        _classifier_kernel,
        out_shape=jax.ShapeDtypeStruct((1, N_CLASSES), jnp.float32),
        in_specs=[vmem] * 5,
        out_specs=vmem,
        cost_estimate=cost,
    )(img_f, ing_f, inst_f, w_fused, b_fused)


def _reference(img_features, ing_encodings, inst_encodings, w1, b1, w2, b2):
    """True f32 two-layer reference (unfused), HIGHEST matmul precision."""
    ing_mean = jnp.mean(ing_encodings, axis=0, keepdims=True)
    inst_mean = jnp.mean(inst_encodings, axis=0, keepdims=True)
    x = jnp.concatenate([img_features, ing_mean, inst_mean], axis=1).astype(jnp.float32)
    x = jnp.dot(x, w1, precision=jax.lax.Precision.HIGHEST) + b1
    x = jnp.dot(x, w2, precision=jax.lax.Precision.HIGHEST) + b2
    return jax.nn.sigmoid(x)


if __name__ == "__main__":
    key = jax.random.PRNGKey(0)
    k_img, k_ing, k_inst, k_w1, k_b1, k_w2, k_b2 = jax.random.split(key, 7)

    # Inputs (float32, as torch's .float() cast implies).
    img_features = jax.random.normal(k_img, (1, D_IMG), dtype=jnp.float32)
    ing_encodings = jax.random.normal(k_ing, (N_ING, D_ENC), dtype=jnp.float32)
    inst_encodings = jax.random.normal(k_inst, (N_INST, D_ENC), dtype=jnp.float32)

    # Deterministic parameter init (PyTorch Linear-style uniform bounds).
    bound1 = 1.0 / (INP_DIMS ** 0.5)
    bound2 = 1.0 / (HIDDEN ** 0.5)
    w1 = jax.random.uniform(k_w1, (INP_DIMS, HIDDEN), jnp.float32, -bound1, bound1)
    b1 = jax.random.uniform(k_b1, (HIDDEN,), jnp.float32, -bound1, bound1)
    w2 = jax.random.uniform(k_w2, (HIDDEN, N_CLASSES), jnp.float32, -bound2, bound2)
    b2 = jax.random.uniform(k_b2, (N_CLASSES,), jnp.float32, -bound2, bound2)

    params = prepare_params(w1, b1, w2, b2)   # one-time offline layer fusion
    forward = jax.jit(multilabel_classifier)

    out = forward(img_features, ing_encodings, inst_encodings, params)
    out = jax.block_until_ready(out)

    ref = _reference(img_features, ing_encodings, inst_encodings, w1, b1, w2, b2)
    assert out.shape == (1, N_CLASSES)
    # Tolerance covers the MXU's internal f32-matmul pass precision and the
    # (exact-in-real-arithmetic) fused-vs-unfused summation-order difference;
    # sigmoid outputs live in (0, 1) so 2e-3 absolute is a meaningful check
    # against the true f32 model (not a rounded self-consistent copy).
    assert jnp.allclose(out, ref, atol=2e-3, rtol=1e-3)
    print("KERNEL_OK")
</pallas_src>

<mosaic_0001>
module attributes {stable_mosaic.version = 11 : i64} {
  func.func @_classifier_kernel(%arg0: memref<1x64xf32, #tpu.memory_space<vmem>>, %arg1: memref<8x32xf32, #tpu.memory_space<vmem>>, %arg2: memref<6x32xf32, #tpu.memory_space<vmem>>, %arg3: memref<128x16xf32, #tpu.memory_space<vmem>>, %arg4: memref<1x16xf32, #tpu.memory_space<vmem>>, %arg5: memref<1x16xf32, #tpu.memory_space<vmem>>) attributes {dimension_semantics = [], scalar_prefetch = 0 : i64, scratch_operands = 0 : i64, tpu.core_type = #tpu.core_type<tc>} {
    %c0 = arith.constant 0 : index
    %c0_0 = arith.constant 0 : index
    %0 = vector.load %arg1[%c0, %c0_0] : memref<8x32xf32, #tpu.memory_space<vmem>>, vector<8x32xf32>
    %cst = arith.constant dense<0.000000e+00> : vector<32xf32>
    %1 = vector.multi_reduction <add>, %0, %cst [0] : vector<8x32xf32> to vector<32xf32>
    %2 = vector.shape_cast %1 : vector<32xf32> to vector<1x32xf32>
    %cst_1 = arith.constant 8.000000e+00 : f32
    %3 = vector.broadcast %cst_1 : f32 to vector<1x32xf32>
    %4 = arith.divf %2, %3 : vector<1x32xf32>
    %c0_2 = arith.constant 0 : index
    %c0_3 = arith.constant 0 : index
    %5 = vector.load %arg2[%c0_2, %c0_3] : memref<6x32xf32, #tpu.memory_space<vmem>>, vector<6x32xf32>
    %cst_4 = arith.constant dense<0.000000e+00> : vector<32xf32>
    %6 = vector.multi_reduction <add>, %5, %cst_4 [0] : vector<6x32xf32> to vector<32xf32>
    %7 = vector.shape_cast %6 : vector<32xf32> to vector<1x32xf32>
    %cst_5 = arith.constant 6.000000e+00 : f32
    %8 = vector.broadcast %cst_5 : f32 to vector<1x32xf32>
    %9 = arith.divf %7, %8 : vector<1x32xf32>
    %c0_6 = arith.constant 0 : index
    %c0_7 = arith.constant 0 : index
    %10 = vector.load %arg0[%c0_6, %c0_7] : memref<1x64xf32, #tpu.memory_space<vmem>>, vector<1x64xf32>
    %c0_8 = arith.constant 0 : index
    %c0_9 = arith.constant 0 : index
    %11 = vector.load %arg3[%c0_8, %c0_9] : memref<128x16xf32, #tpu.memory_space<vmem>>, vector<64x16xf32>
    %cst_10 = arith.constant dense<0.000000e+00> : vector<1x16xf32>
    %12 = tpu.matmul %10, %11, %cst_10 {dimension_numbers = #tpu.dot_dimension_numbers<[1], [0], [0], [1], [0, 0, 1, 1], [], []>} : vector<1x64xf32>, vector<64x16xf32>, vector<1x16xf32> -> vector<1x16xf32>
    %c64 = arith.constant 64 : index
    %c0_11 = arith.constant 0 : index
    %13 = vector.load %arg3[%c64, %c0_11] : memref<128x16xf32, #tpu.memory_space<vmem>>, vector<32x16xf32>
    %cst_12 = arith.constant dense<0.000000e+00> : vector<1x16xf32>
    %14 = tpu.matmul %4, %13, %cst_12 {dimension_numbers = #tpu.dot_dimension_numbers<[1], [0], [0], [1], [0, 0, 1, 1], [], []>} : vector<1x32xf32>, vector<32x16xf32>, vector<1x16xf32> -> vector<1x16xf32>
    %15 = arith.addf %12, %14 : vector<1x16xf32>
    %c96 = arith.constant 96 : index
    %c0_13 = arith.constant 0 : index
    %16 = vector.load %arg3[%c96, %c0_13] : memref<128x16xf32, #tpu.memory_space<vmem>>, vector<32x16xf32>
    %cst_14 = arith.constant dense<0.000000e+00> : vector<1x16xf32>
    %17 = tpu.matmul %9, %16, %cst_14 {dimension_numbers = #tpu.dot_dimension_numbers<[1], [0], [0], [1], [0, 0, 1, 1], [], []>} : vector<1x32xf32>, vector<32x16xf32>, vector<1x16xf32> -> vector<1x16xf32>
    %18 = arith.addf %15, %17 : vector<1x16xf32>
    %c0_15 = arith.constant 0 : index
    %c0_16 = arith.constant 0 : index
    %19 = vector.load %arg4[%c0_15, %c0_16] : memref<1x16xf32, #tpu.memory_space<vmem>>, vector<1x16xf32>
    %20 = arith.addf %18, %19 : vector<1x16xf32>
    %21 = arith.negf %20 : vector<1x16xf32>
    %22 = math.exp %21 : vector<1x16xf32>
    %cst_17 = arith.constant 1.000000e+00 : f32
    %23 = vector.broadcast %cst_17 : f32 to vector<1x16xf32>
    %24 = arith.addf %23, %22 : vector<1x16xf32>
    %25 = arith.divf %23, %24 : vector<1x16xf32>
    %c0_18 = arith.constant 0 : index
    %c0_19 = arith.constant 0 : index
    %26 = vector.load %arg5[%c0_18, %c0_19] : memref<1x16xf32, #tpu.memory_space<vmem>>, vector<1x16xf32>
    tpu.vector_store %arg5[%c0_18, %c0_19], %25 {strides = array<i32>} : memref<1x16xf32, #tpu.memory_space<vmem>>, vector<1x16xf32>,
    return
  }
}

</mosaic_0001>

<bundles_post_ra>
// kernel: multilabel_classifier.1
= control target key start
LH: loop header
LB: loop body
LE: loop exit
PB: predicated region body
PF: predicated region fallthrough
CT: control target
= control target key end

     0   :  { %v223_v4 = vmov 6.0   ;;  %vm22_vm0 = vcmask 261120   ;;  %vm39_vm1 = vcmask 259072   ;;  %v224_v7 = vmov 8.0   ;;  %s323_s0 = inlined_call_operand.vmem [shape: f32[1,64], index: 0, kind: input, shape index: {}]   ;;  %s324_s1 = inlined_call_operand.vmem [shape: f32[8,32], index: 1, kind: input, shape index: {}]   ;;  %s325_s2 = inlined_call_operand.vmem [shape: f32[6,32], index: 2, kind: input, shape index: {}]   ;;  %s326_s3 = inlined_call_operand.vmem [shape: f32[128,16], index: 3, kind: input, shape index: {}]   ;;  %s327_s4 = inlined_call_operand.vmem [shape: f32[1,16], index: 4, kind: input, shape index: {}]   ;;  %s328_s5 = inlined_call_operand.hbm [shape: f32[1,16], index: 5, kind: output, shape index: {}]  }
   0x1   :  { %v63_v0 = vld [vmem:[%s326_s3 + $0x38] sm:$0xff]  ;;  %v62_v1 = vld [vmem:[%s326_s3 + $0x30] sm:$0xff]  ;;  %189 = vrcp.f32 %v223_v4  ;;  %v61_v5 = vld [vmem:[%s326_s3 + $0x28] sm:$0xff] }
   0x2   :  { %103 = vmatpush.msra.mxu1 %v63_v0  ;;  %v118_v2 = vld [vmem:[%s326_s3 + $0x78] sm:$0xff]  ;;  %v117_v3 = vld [vmem:[%s326_s3 + $0x70] sm:$0xff]  ;;  %191 = vrcp.f32 %v224_v7  ;;  %v60_v8 = vld [vmem:[%s326_s3 + $0x20] sm:$0xff] }
   0x3   :  { %134 = vmatpush.msra.mxu2 %v118_v2  ;;  %v67_v6 = vld [vmem:[%s326_s3 + $0x58] sm:$0xff]  ;;  %v116_v9 = vld [vmem:[%s326_s3 + $0x68] sm:$0xff]  ;;  %v66_v10 = vld [vmem:[%s326_s3 + $0x50] sm:$0xff] }
   0x4   :  { %104 = vmatpush.msra.mxu1 %v62_v1  ;;  %83 = vmatpush.msra.mxu0 %v67_v6  ;;  %v21_v11 = vld [vmem:[%s324_s1] sm:$0xff]  ;;  %v65_v13 = vld [vmem:[%s326_s3 + $0x48] sm:$0xff]  ;;  %v59_v17 = vld [vmem:[%s326_s3 + $0x18] sm:$0xff] }
   0x5   :  { %135 = vmatpush.msra.mxu2 %v117_v3  ;;  %v38_v12 = vld [vmem:[%s325_s2] sm:$0x3f]  ;;  %v23_v15 = vsel %vm22_vm0, %v21_v11, 0.0 }
   0x6   :  { %105 = vmatpush.msra.mxu1 %v61_v5  ;;  %84 = vmatpush.msra.mxu0 %v66_v10  ;;  %v115_v14 = vld [vmem:[%s326_s3 + $0x60] sm:$0xff]  ;;  %v40_v16 = vsel %vm39_vm1, %v38_v12, 0.0  ;;  %v24_v18 = vrot.slane %v23_v15, 4 }
   0x7   :  { %136 = vmatpush.msra.mxu2 %v116_v9  ;;  %v41_v19 = vrot.slane %v40_v16, 4  ;;  %v64_v20 = vld [vmem:[%s326_s3 + $0x40] sm:$0xff] }
   0x8   :  { %10 = vsyncpa [#allocation3], 0  ;;  %v190_v21 = vpop.eup %189  ;;  %106 = vmatpush.msra.mxu1 %v60_v8  ;;  %85 = vmatpush.msra.mxu0 %v65_v13  ;;  %v58_v23 = vld [vmem:[%s326_s3 + $0x10] sm:$0xff]  ;;  %v25_v24 = vadd.f32 %v24_v18, %v23_v15  ;;  %v57_v31 = vld [vmem:[%s326_s3 + $0x8] sm:$0xff]  ;;  %vm91_vm3 = vcmask 523264   ;;  %s225_s29 = smov [#allocation2]  }
   0x9   :  { %v192_v22 = vpop.eup %191  ;;  %137 = vmatpush.msra.mxu2 %v115_v14  ;;  %v42_v25 = vadd.f32 %v41_v19, %v40_v16  ;;  %v48_v26 = vmul.f32 6.0, %v190_v21  ;;  %v56_v36 = vld [vmem:[%s326_s3] sm:$0xff]  ;;  %vm52_vm2 = vweird.f32 %v190_v21  ;;  %s171_s30 = sshll.u32 %s225_s29, 4  ;;  %vm164_vm8 = vcmask 122880   ;;  %s172_s30 = int_to_ptr.vmem [resolvable:$true] %s171_s30 }
   0xa   :  { %107 = vmatpush.msra.mxu1 %v59_v17  ;;  %86 = vmatpush.msra.mxu0 %v64_v20  ;;  %v31_v27 = vmul.f32 8.0, %v192_v22  ;;  %v26_v28 = vrot.slane %v25_v24, 2  ;;  %v55_v38 = vld [vmem:[%s323_s0] sm:$0x1]  ;;  %vm35_vm4 = vweird.f32 %v192_v22 }
   0xb   :  { %v43_v29 = vrot.slane %v42_v25, 2  ;;  %v49_v30 = vsub.f32 1.0, %v48_v26  ;;  %v143_v53 = vld [vmem:[%s327_s4] sm:$0x1]  ;;  %s173_s4 = sshll.u32 %s328_s5, 4  ;;  %s174_s4 = int_to_ptr.hbm [resolvable:$true] %s173_s4 }
   0xc   :  { %108 = vmatpush.msra.mxu1 %v58_v23  ;;  %v32_v32 = vsub.f32 1.0, %v31_v27  ;;  %v27_v33 = vadd.f32 %v26_v28, %v25_v24 }
   0xd   :  { %v44_v34 = vadd.f32 %v43_v29, %v42_v25  ;;  %v50_v35 = vmul.f32 %v190_v21, %v49_v30 }
   0xe   :  { %109 = vmatpush.msra.mxu1 %v57_v31  ;;  %v33_v37 = vmul.f32 %v192_v22, %v32_v32  ;;  %v28_v41 = vrot.slane %v27_v33, 1 }
   0xf   :  { %v45_v39 = vrot.slane %v44_v34, 1  ;;  %v51_v40 = vadd.f32 %v190_v21, %v50_v35 }
  0x10   :  { %110 = vmatpush.msra.mxu1 %v56_v36  ;;  %v34_v42 = vadd.f32 %v192_v22, %v33_v37  ;;  %v29_v45 = vadd.f32 %v28_v41, %v27_v33 }
  0x11   :  { %v46_v43 = vadd.f32 %v45_v39, %v44_v34  ;;  %v53_v44 = vsel %vm52_vm2, %v190_v21, %v51_v40  ;;  %183 = vmatmul.msk.f32.vlgmr.msra.gmra.mxu1 %vm91_vm3, %v55_v38 }
  0x12   :  { %v36_v46 = vsel %vm35_vm4, %v192_v22, %v34_v42 }
  0x13   :  { %v54_v47 = vmul.f32 %v53_v44, %v46_v43  ;;  %v37_v48 = vmul.f32 %v36_v46, %v29_v45 }
  0x15   :  { %184 = vmatmul.msk.f32.vlgmr.msra.gmra.mxu2 %vm22_vm0, %v54_v47  ;;  %182 = vmatmul.msk.f32.vlgmr.msra.gmra.mxu0 %vm22_vm0, %v37_v48 }
  0x8e   :  { %v112_v50 = vpop.f32.mrf.mxu1 }
  0x92   :  { %v88_v49 = vpop.f32.mrf.mxu0 }
  0x93   :  { %v113_v51 = vadd.f32 %v112_v50, %v88_v49 }
  0x98   :  { %v139_v52 = vpop.f32.mrf.mxu2 }
  0x99   :  { %v142_v54 = vadd.f32 %v139_v52, %v113_v51 }
  0x9b   :  { %v144_v55 = vadd.f32 %v143_v53, %v142_v54 }
  0x9d   :  { %v185_v56 = vmul.f32 -1.442695, %v144_v55 }
  0x9f   :  { %193 = vpow2.f32 %v185_v56 }
  0xa5   :  { %v194_v57 = vpop.eup %193 }
  0xa6   :  { %v148_v58 = vadd.f32 1.0, %v194_v57 }
  0xa8   :  { %195 = vrcp.f32 %v148_v58  ;;  %v160_v62 = vand.u32 2147483648, %v148_v58  ;;  %v158_v0 = vand.u32 2147483647, %v148_v58  ;;  %vm154_vm6 = vweird.f32 %v148_v58 }
  0xaa   :  { %v161_v2 = vor.u32 1.1754944e-38, %v160_v62  ;;  %vm159_vm9 = vcmp.eq.f32.partialorder %v158_v0, 8.507059e+37 }
  0xae   :  { %v196_v59 = vpop.eup %195 }
  0xaf   :  { %v150_v60 = vmul.f32 %v196_v59, %v148_v58  ;;  %vm155_vm5 = vweird.f32 %v196_v59 }
  0xb0   :  { %vm156_vm7 = vmor %vm154_vm6, %vm155_vm5 }
  0xb1   :  { %v151_v61 = vsub.f32 1.0, %v150_v60 }
  0xb3   :  { %v152_v63 = vmul.f32 %v196_v59, %v151_v61 }
  0xb5   :  { %v153_v1 = vadd.f32 %v196_v59, %v152_v63 }
  0xb7   :  { %v157_v3 = vsel %vm156_vm7, %v196_v59, %v153_v1 }
  0xb8   :  { %v162_v4 = vsel %vm159_vm9, %v161_v2, %v157_v3 }
  0xb9   :  { %165 = vst.msk [vmem:[#allocation2] sm:$0x1] %vm164_vm8, %v162_v4 }
  0xba   :  { %176 = dma.vmem_to_hbm [thread:$0]  %s172_s30, 16, %s174_s4, [#allocation3]  }
  0xbb   :  { %221 = dma.done.wait [#allocation3], 16  }
  0xbc   :  { %222 = vsyncadd [#allocation3], 4294967280 }
  0xbd   :  { %181 = vsyncpa [#allocation3], 1 }

</bundles_post_ra>
